<compile_context>
chip_gen: v5e
topology: v5e:2x2
jax: 0.10.0
libtpu: 0.0.40
codegen_flags: <defaults>
</compile_context>

<pallas_src>
import functools

import jax
import jax.numpy as jnp
from jax import lax
from jax.experimental import pallas as pl
from jax.experimental.pallas import tpu as pltpu


def _reduce_rows(x_ref, nrows, chunk, pad_value):
    """Max-reduce the first `nrows` sublane rows of x_ref -> (Bt, Ct).

    The accumulator is kept fully reduced ((Bt, Ct), ~Ct/128 vregs) so long
    sequences never spill; `chunk` rows are loaded per step.
    """
    bt, _, ct = x_ref.shape
    dtype = x_ref.dtype
    n_full, rem = divmod(nrows, chunk)
    red = None
    if n_full > 0:
        if n_full <= 8:
            red = jnp.max(x_ref[:, pl.ds(0, chunk), :], axis=1)
            for i in range(1, n_full):
                red = jnp.maximum(
                    red, jnp.max(x_ref[:, pl.ds(i * chunk, chunk), :], axis=1))
        else:
            init = jnp.full((bt, ct), pad_value, dtype)

            def body(i, r):
                start = pl.multiple_of(i * chunk, chunk)
                return jnp.maximum(
                    r, jnp.max(x_ref[:, pl.ds(start, chunk), :], axis=1))

            red = lax.fori_loop(0, n_full, body, init, unroll=8)
    if rem:
        tail = jnp.max(x_ref[:, pl.ds(n_full * chunk, rem), :], axis=1)
        red = tail if red is None else jnp.maximum(red, tail)
    return red


def _global_max_kernel(x_ref, o_ref, *, seq_len, l_tile, reduce_chunk,
                       pad_value):
    """x_ref: (Bt, Lt, Ct) VMEM tile; o_ref: (Bt, 1, Ct).

    Grid axis 2 walks sequence (L) chunks; the output block index is constant
    along it, so o_ref is a resident running-max accumulator (P3 pattern).
    """
    n_steps = -(-seq_len // l_tile)

    if n_steps == 1:
        o_ref[:, 0, :] = _reduce_rows(x_ref, seq_len, reduce_chunk, pad_value)
        return

    l_idx = pl.program_id(2)
    rem = seq_len - (n_steps - 1) * l_tile   # valid rows of the last L block

    @pl.when(l_idx == 0)
    def _():
        o_ref[...] = jnp.full(o_ref.shape, pad_value, o_ref.dtype)

    def reduce_and_combine(nrows):
        red = _reduce_rows(x_ref, nrows, reduce_chunk, pad_value)
        o_ref[:, 0, :] = jnp.maximum(o_ref[:, 0, :], red)

    if rem == l_tile:
        reduce_and_combine(l_tile)
    else:
        @pl.when(l_idx < n_steps - 1)
        def _():
            reduce_and_combine(l_tile)

        @pl.when(l_idx == n_steps - 1)
        def _():
            reduce_and_combine(rem)


def _window_max_kernel(x_ref, o_ref, *, kernel_size, stride, dilation, padding,
                       seq_len, l_out, pad_value, out_chunk):
    """x_ref: (Bt, L, Ct) VMEM tile; o_ref: (Bt, l_out, Ct).

    All pooling parameters are static, so per-tap valid output ranges are
    computed in Python; interior outputs are a pure elementwise max of
    (strided) ref loads and only boundary rows touch implicit padding.
    """
    # Tap d is valid for output o iff 0 <= o*stride + d*dilation - padding < L.
    taps = []                                       # (off, o_lo, o_hi)
    for d in range(kernel_size):
        off = d * dilation - padding
        if off > seq_len - 1:
            continue
        o_lo = 0 if off >= 0 else (-off + stride - 1) // stride
        o_hi = min(l_out, (seq_len - 1 - off) // stride + 1)
        if o_hi <= o_lo:
            continue
        taps.append((off, o_lo, o_hi))
    assert taps, "max_pool: no kernel tap covers any output position"

    # Interior = output rows for which *every* tap is in-bounds.
    lo_c = max(o_lo for _, o_lo, _ in taps)
    hi_c = min(o_hi for _, _, o_hi in taps)
    lo_i, hi_i = (lo_c, hi_c) if hi_c > lo_c else (0, 0)

    def load_tap(o_start, cnt, off):
        src = o_start * stride + off                # >= 0 by construction
        if stride == 1:
            return x_ref[:, pl.ds(src, cnt), :]
        return x_ref[:, pl.ds(src, cnt, stride=stride), :]

    # Interior rows: elementwise max of strided loads, processed in sublane
    # chunks so the live accumulator stays ~16 vregs (no spills).
    for cs in range(lo_i, hi_i, out_chunk):
        cnt = min(out_chunk, hi_i - cs)
        acc = None
        for off, _, _ in taps:
            tap = load_tap(cs, cnt, off)
            acc = tap if acc is None else jnp.maximum(acc, tap)
        o_ref[:, pl.ds(cs, cnt), :] = acc

    # Boundary rows (window hits implicit padding / right overhang): handled
    # per row -- only O(padding/stride + 1) rows per edge.
    for o in list(range(0, lo_i)) + list(range(hi_i, l_out)):
        row = None
        for d in range(kernel_size):
            src = o * stride + d * dilation - padding
            if 0 <= src < seq_len:
                v = x_ref[:, src, :]
                row = v if row is None else jnp.maximum(row, v)
        # PyTorch's padding <= kernel_size/2 constraint + ceil_mode clamp make
        # an all-padding window unreachable; guard it explicitly.
        assert row is not None, "max_pool: window falls entirely in padding"
        o_ref[:, o, :] = row


def _round_up(v, m):
    return ((v + m - 1) // m) * m


def max_pool(x, stride=None, padding=0, dilation=1, dimension=1,
             kernel_size=None, ceil_mode=False):
    """Equivalent of fastNLP MaxPool.forward for dimension=1.

    x: (B, L, C) array (the tensor PyTorch's forward receives).
    Returns (B, C) when the pooled length is 1 (matching .squeeze(-1)),
    else (B, C, L_out).
    """
    assert dimension == 1, "only 1d pooling implemented"
    # TODO(synk): dimension=2/3 (MaxPool2d/3d) paths are not implemented here.
    B, L, C = x.shape
    k = kernel_size if kernel_size is not None else L
    s = stride if stride is not None else k
    assert 2 * padding <= k, "padding should be at most half of kernel size"

    eff = dilation * (k - 1) + 1
    num = L + 2 * padding - eff
    assert num >= 0, "effective kernel larger than padded input"
    if ceil_mode:
        l_out = -(-num // s) + 1
        # PyTorch: the last window must not start entirely in the right padding.
        if (l_out - 1) * s >= L + padding:
            l_out -= 1
    else:
        l_out = num // s + 1
    assert l_out >= 1

    if jnp.issubdtype(x.dtype, jnp.floating):
        pad_value = float("-inf")
    else:
        pad_value = int(jnp.iinfo(x.dtype).min)

    itemsize = jnp.dtype(x.dtype).itemsize

    # ---- Generation-aware tile target / VMEM limit --------------------------
    try:
        vmem_cap = int(pltpu.get_tpu_info().vmem_capacity_bytes)
    except Exception:  # query unavailable (interpret mode etc.): assume smallest
        vmem_cap = 64 * 1024 * 1024
    if vmem_cap <= 80 * 1024 * 1024:       # v7x-class: 64 MiB VMEM, 3.2 TB/s HBM
        target_bytes = 6 * 1024 * 1024
    else:                                  # v5e / v6e: 128 MiB VMEM
        target_bytes = 8 * 1024 * 1024
    vmem_limit = max(32 * 1024 * 1024,
                     min((vmem_cap * 3) // 4, 64 * 1024 * 1024))

    global_max = (k == L and dilation == 1 and padding == 0 and l_out == 1)

    def _channel_tile(rows_for_sizing):
        # Channels only get tiled in multiples of 128 (lane-dense stores).
        # Ragged last channel tile is safe: the op is per-channel elementwise,
        # garbage OOB input lanes only feed masked (never-stored) outputs.
        if C > 128 and C * rows_for_sizing * itemsize > target_bytes:
            ct_lanes = max(1, target_bytes // (rows_for_sizing * 128 * itemsize))
            return int(min(C, ct_lanes * 128))
        return C

    def _ensure_two_parallel_steps(bt, ct):
        # v7x has two TensorCores; make the parallel axes expose >= 2 steps.
        if pl.cdiv(B, bt) * pl.cdiv(C, ct) < 2:
            if B > 1:
                bt = (B + 1) // 2
            elif C > 128:
                ct = max(128, _round_up(max(1, ct // 2), 128))
        return bt, ct

    if global_max:
        # ---- Global max over the sequence (the module's default config) ----
        Ct = _channel_tile(min(L, 256))
        # L tiling bounds VMEM independent of sequence length.
        Lt = target_bytes // (Ct * itemsize)
        Lt = int(min(L, max(8, (Lt // 8) * 8)))
        Bt = int(max(1, min(B, target_bytes // (Lt * Ct * itemsize))))
        # Keep one sublane row of the tile <= 64 KiB so the (Bt, Ct)
        # accumulator + per-chunk loads never spill.
        Bt = int(min(Bt, max(1, 65536 // (Ct * itemsize))))
        Bt, Ct = _ensure_two_parallel_steps(Bt, Ct)
        reduce_chunk = int(max(1, min(128, 65536 // (Bt * Ct * itemsize))))
        grid = (pl.cdiv(B, Bt), pl.cdiv(C, Ct), pl.cdiv(L, Lt))

        kern = functools.partial(
            _global_max_kernel, seq_len=L, l_tile=Lt,
            reduce_chunk=reduce_chunk, pad_value=pad_value)
        cost = pl.CostEstimate(
            flops=int(B * C * L), transcendentals=0,
            bytes_accessed=int((B * L * C + B * C) * itemsize))
        out = pl.pallas_call(
            kern,
            out_shape=jax.ShapeDtypeStruct((B, 1, C), x.dtype),
            grid=grid,
            in_specs=[pl.BlockSpec((Bt, Lt, Ct), lambda b, c, l: (b, l, c))],
            out_specs=pl.BlockSpec((Bt, 1, Ct), lambda b, c, l: (b, 0, c)),
            compiler_params=pltpu.CompilerParams(
                dimension_semantics=("parallel", "parallel", "arbitrary"),
                vmem_limit_bytes=vmem_limit),
            cost_estimate=cost,
        )(x)
        # (B, 1, C) -> (B, C): metadata-only reshape; matches PyTorch's
        # (B, C, 1).squeeze(-1).  No HBM transpose round trip.
        return out.reshape(B, C)

    # ---- General windowed 1-D max pool --------------------------------------
    # TODO(synk): the windowed path keeps the full sequence in the block; very
    # long sequences (L*Ct*itemsize approaching the VMEM limit) would need an
    # overlapping-window L tiling that BlockSpec cannot express directly.
    Ct = _channel_tile(L)
    Bt = int(max(1, min(B, target_bytes // max(1, L * Ct * itemsize))))
    Bt = int(min(Bt, max(1, 65536 // (Ct * itemsize))))
    Bt, Ct = _ensure_two_parallel_steps(Bt, Ct)
    grid = (pl.cdiv(B, Bt), pl.cdiv(C, Ct))
    out_chunk = int(max(1, min(128, 65536 // (Bt * Ct * itemsize))))

    kern = functools.partial(
        _window_max_kernel, kernel_size=k, stride=s, dilation=dilation,
        padding=padding, seq_len=L, l_out=l_out, pad_value=pad_value,
        out_chunk=out_chunk)
    cost = pl.CostEstimate(
        flops=int(B * C * l_out * k), transcendentals=0,
        bytes_accessed=int((B * L * C + B * l_out * C) * itemsize))
    out = pl.pallas_call(
        kern,
        out_shape=jax.ShapeDtypeStruct((B, l_out, C), x.dtype),
        grid=grid,
        in_specs=[pl.BlockSpec((Bt, L, Ct), lambda b, c: (b, 0, c))],
        out_specs=pl.BlockSpec((Bt, l_out, Ct), lambda b, c: (b, 0, c)),
        compiler_params=pltpu.CompilerParams(
            dimension_semantics=("parallel", "parallel"),
            vmem_limit_bytes=vmem_limit),
        cost_estimate=cost,
    )(x)

    # PyTorch: MaxPool1d output is (B, C, L_out), then .squeeze(-1).
    # TODO(synk): for l_out >= 128 the transpose could be fused into the kernel
    # (lane-dense transposed stores) to avoid this extra HBM round trip.
    out = jnp.transpose(out, (0, 2, 1))
    if l_out == 1:
        out = out[..., 0]
    return out


if __name__ == "__main__":
    key = jax.random.PRNGKey(0)
    B, L, C = 2, 8, 32
    x = jax.random.normal(key, (B, L, C), dtype=jnp.float32)

    # Default module config: dimension=1, kernel_size=None -> global max over seq.
    y = jax.block_until_ready(max_pool(x))
    assert y.shape == (B, C)
    assert jnp.allclose(y, jnp.max(x, axis=1)), "global max-pool mismatch"

    # Windowed config: kernel_size=3, stride=2 -> (B, C, 3).
    y2 = jax.block_until_ready(max_pool(x, kernel_size=3, stride=2))
    assert y2.shape == (B, C, 3)
    ref2 = jnp.stack(
        [jnp.max(x[:, i * 2:i * 2 + 3, :], axis=1) for i in range(3)], axis=-1)
    assert jnp.allclose(y2, ref2), "windowed max-pool mismatch"

    # Padded config: kernel_size=3, stride=2, padding=1 -> (B, C, 4).
    y3 = jax.block_until_ready(max_pool(x, kernel_size=3, stride=2, padding=1))
    assert y3.shape == (B, C, 4)
    xpad = jnp.pad(x, ((0, 0), (1, 1), (0, 0)), constant_values=-jnp.inf)
    ref3 = jnp.stack(
        [jnp.max(xpad[:, i * 2:i * 2 + 3, :], axis=1) for i in range(4)], axis=-1)
    assert jnp.allclose(y3, ref3), "padded max-pool mismatch"

    # ceil_mode config: kernel_size=3, stride=2, ceil_mode=True -> (B, C, 4);
    # exercises the right-boundary (overhang) rows.
    y4 = jax.block_until_ready(
        max_pool(x, kernel_size=3, stride=2, ceil_mode=True))
    assert y4.shape == (B, C, 4)
    ref4 = jnp.stack(
        [jnp.max(x[:, i * 2:min(i * 2 + 3, L), :], axis=1) for i in range(4)],
        axis=-1)
    assert jnp.allclose(y4, ref4), "ceil_mode max-pool mismatch"

    print("KERNEL_OK")
</pallas_src>

<mosaic_0001>
module attributes {stable_mosaic.version = 11 : i64} {
  func.func @_global_max_kernel(%arg0: i32, %arg1: i32, %arg2: i32, %arg3: memref<1x8x32xf32, #tpu.memory_space<vmem>>, %arg4: memref<1x1x32xf32, #tpu.memory_space<vmem>>) attributes {dimension_semantics = [#tpu.dimension_semantics<parallel>, #tpu.dimension_semantics<parallel>, #tpu.dimension_semantics<arbitrary>], iteration_bounds = array<i64: 2, 1, 1>, scalar_prefetch = 0 : i64, scratch_operands = 0 : i64, tpu.core_type = #tpu.core_type<tc>, window_params = [{transform_indices = @transform_0, window_bounds = array<i64: 1, 8, 32>}, {transform_indices = @transform_1, window_bounds = array<i64: 1, 1, 32>}]} {
    %c0 = arith.constant 0 : index
    %c0_0 = arith.constant 0 : index
    %c0_1 = arith.constant 0 : index
    %0 = vector.load %arg3[%c0, %c0_0, %c0_1] : memref<1x8x32xf32, #tpu.memory_space<vmem>>, vector<1x8x32xf32>
    %cst = arith.constant dense<0xFF800000> : vector<1x32xf32>
    %1 = vector.multi_reduction <maximumf>, %0, %cst [1] : vector<1x8x32xf32> to vector<1x32xf32>
    %c0_2 = arith.constant 0 : index
    %c0_3 = arith.constant 0 : index
    %c0_4 = arith.constant 0 : index
    %2 = vector.load %arg4[%c0_2, %c0_3, %c0_4] : memref<1x1x32xf32, #tpu.memory_space<vmem>>, vector<1x1x32xf32>
    %3 = vector.shape_cast %2 : vector<1x1x32xf32> to vector<1x32xf32>
    %4 = vector.shape_cast %1 : vector<1x32xf32> to vector<1x1x32xf32>
    tpu.vector_store %arg4[%c0_2, %c0_3, %c0_4], %4 {strides = array<i32>} : memref<1x1x32xf32, #tpu.memory_space<vmem>>, vector<1x1x32xf32>,
    return
  }
  func.func @transform_0(%arg0: i32, %arg1: i32, %arg2: i32) -> (i32, i32, i32) {
    %c0_i32 = arith.constant 0 : i32
    return %arg0, %arg2, %arg1 : i32, i32, i32
  }
  func.func @transform_1(%arg0: i32, %arg1: i32, %arg2: i32) -> (i32, i32, i32) {
    %c0_i32 = arith.constant 0 : i32
    %c0_i32_0 = arith.constant 0 : i32
    return %arg0, %c0_i32, %arg1 : i32, i32, i32
  }
}

</mosaic_0001>

<bundles_post_ra>
// kernel: tpu_custom_call.1
= control target key start
LH: loop header
LB: loop body
LE: loop exit
PB: predicated region body
PF: predicated region fallthrough
CT: control target
= control target key end

     0   :  { %6 = vsyncpa [#allocation3], 0  ;;  %s579_s0 = inlined_call_operand.hbm [shape: f32[2,8,32], index: 0, kind: input, shape index: {}]   ;;  %s580_s1 = inlined_call_operand.hbm [shape: f32[2,1,32], index: 1, kind: output, shape index: {}]  }
   0x1   :  { %8 = vsyncpa [#allocation3 + $0x1], 0 }
   0x2   :  { %9 = vsyncpa [#allocation4], 0 }
   0x3   :  { %11 = vsyncpa [#allocation4 + $0x1], 0  ;;  %s458_s6 = smov 0   ;;  %s460_s7 = smov 0  }
   0x4   :  { %s462_s8 = smov 0   ;;  %s464_s9 = smov 0  }
   0x5   :  { %s466_s10 = smov 0   ;;  %s468_s11 = smov 0  }
   0x6 LB: > { %s262_s12 = sadd.s32 4294967295, %s446_s11   ;;  %s263_s13 = sadd.s32 4294967294, %s446_s11   ;;  %s446_s11 = sphi %s468_s11, %s17_s11   ;;  %s442_s10 = sphi %s466_s10, %s589_s10   ;;  %s438_s9 = sphi %s464_s9, %s588_s9   ;;  %s434_s8 = sphi %s462_s8, %s587_s8   ;;  %s430_s7 = sphi %s460_s7, %s586_s7   ;;  %s426_s6 = sphi %s458_s6, %s585_s6  }
   0x7   : > { %s36_s14 = sadd.s32 1, %s442_s10  ;;  %s47_s15 = sadd.s32 1, %s434_s8 }
   0x8   : > { %p38_p0 = scmp.ge.s32.totalorder %s36_s14, 2  ;;  %p54_p1 = scmp.ne.s32.totalorder %s434_s8, %s430_s7 }
   0x9   : > { %p55_p2 = scmp.eq.s32.totalorder %s446_s11, 0  ;;  %p60_p3 = scmp.ne.s32.totalorder %s430_s7, %s426_s6 }
   0xa   : > { %s591_s14 = smov (%p38_p0, %s36_s14), 0  ;;  %p61_p5 = scmp.eq.s32.totalorder %s262_s12, 0 }
   0xb   : > { %p499_p4 = por %p55_p2, %p54_p1  ;;  %s40_s17 = ssub.s32 %s442_s10, %s591_s14 }
   0xc   : > { %p86_p6 = scmp.eq.s32.totalorder %s262_s12, 1  ;;  %p45_p7 = scmp.eq.s32.totalorder %s40_s17, 0 }
   0xd   : > { %p505_p8 = por %p61_p5, %p60_p3  ;;  %p92_p10 = scmp.eq.s32.totalorder %s263_s13, 1 }
   0xe   : > { %p509_p9 = por %p86_p6, %p54_p1  ;;  %p265_p12 = scmp.ge.s32.totalorder %s446_s11, 2 }
   0xf   : > { %s514_s20 = scalar_select %p45_p7, %s434_s8, %s47_s15  }
  0x10   : > { %p516_p11 = por %p92_p10, %p60_p3  ;;  %p284_p13 = scmp.lt.s32.totalorder %s446_s11, 2 }
  0x11   : > { %s112_s22 = sand.u32 1, %s434_s8   ;;  %s267_s24 = sshll.u32 %s442_s10, 3 }
  0x12   : > { %s266_s23 = sshll.u32 %s112_s22, 3  ;;  %s122_s27 = scalar_lea.hbm %s579_s0, %s267_s24 }
  0x13   : > { %s116_s28 = scalar_lea.vmem [#allocation2], %s266_s23  ;;  %s124_s30 = sshll.u32 %s122_s27, 4  ;;  %s125_s30 = int_to_ptr.hbm [resolvable:$true] %s124_s30 }
  0x14   : > { %s126_s29 = sshll.u32 %s116_s28, 4  ;;  %p277_p0 = pnand %p284_p13, %p499_p4  ;;  %s127_s29 = int_to_ptr.vmem [resolvable:$true] %s126_s29 }
  0x15   : > { %p268_p1 = scmp.ge.s32.totalorder %s446_s11, 1  ;;  %p131_p2 = scmp.lt.s32.totalorder %s446_s11, 3 }
  0x16   : > { %s113_s2 = scalar_lea.sflag [#allocation3], %s112_s22 }
  0x17   : > { %279 = dma.hbm_to_vmem [thread:$0]  (!%p277_p0), %s125_s30, 128, %s127_s29, %s113_s2  }
  0x18   : > { %p132_p3 = pnand %p268_p1, %p131_p2 }
  0x19   : > { %s532_s3 = sand.u32 (!%p132_p3), 1, %s430_s7  }
  0x1a   : > { %135 = sbr.rel (%p132_p3) target bundleno = 49 (0x31), region = 24  ;;  %s269_s4 = sshll.u32 (!%p132_p3), %s532_s3, 3 }
  0x1b   : > { %s138_s5 = scalar_lea.sflag (!%p132_p3), [#allocation3], %s532_s3  ;;  %s141_s12 = scalar_lea.vmem (!%p132_p3), [#allocation2], %s269_s4 }
  0x1f   : > { %417 = dma.done.wait (%p505_p8), %s138_s5, 128  }
  0x20   : > { %419 = vsyncadd (%p505_p8), %s138_s5, 4294967168  ;;  %vm161_vm0 = vcmask 261120   ;;  %v160_v0 = vld [vmem:[%s141_s12] sm:$0xff]  ;;  %s181_s16 = scalar_lea.hbm %s580_s1, %s438_s9  ;;  %s159_s17 = scalar_lea.vmem [#allocation5], %s532_s3  ;;  %vm169_vm1 = vcmask 253952  }
  0x21   : > { %v162_v1 = vsel %vm161_vm0, %v160_v0, -inf  ;;  %s183_s22 = sshll.u32 %s159_s17, 4  ;;  %s185_s23 = sshll.u32 %s181_s16, 4  ;;  %s184_s22 = int_to_ptr.vmem [resolvable:$true] %s183_s22  ;;  %s186_s23 = int_to_ptr.hbm [resolvable:$true] %s185_s23 }
  0x22   : > { %v163_v2 = vrot.slane %v162_v1, 4  ;;  %s172_s18 = scalar_lea.sflag [#allocation4], %s532_s3  ;;  %s378_s24 = sshra.s32 %s186_s23, 4  ;;  %s379_s24 = int_to_ptr.hbm [resolvable:$true] %s378_s24 }
  0x23   : > { %s380_s25 = scalar_lea.hbm %s379_s24, 1  ;;  %s384_s27 = scalar_lea.hbm %s580_s1, 2 }
  0x24   : > { %v164_v3 = vmax.f32 %v162_v1, %v163_v2  ;;  %p381_p4 = scmp.ne.s32.totalorder %s379_s24, %s380_s25  ;;  %p385_p7 = scmp.lt.s32.totalorder %s379_s24, %s580_s1 }
  0x25   : > { %p386_p8 = scmp.lt.s32.totalorder %s384_s27, %s380_s25 }
  0x26   : > { %v165_v4 = vrot.slane %v164_v3, 2  ;;  %p382_p5 = pnand %p381_p4, %p509_p9 }
  0x27   : > { %p387_p10 = por %p386_p8, %p385_p7 }
  0x28   : > { %v166_v5 = vmax.f32 %v164_v3, %v165_v4  ;;  %p383_p6 = pneg %p382_p5 }
  0x2a   : > { %v167_v6 = vrot.slane %v166_v5, 1  ;;  %p388_p13 = pnand %p387_p10, %p383_p6 }
  0x2c   : > { %v168_v7 = vmax.f32 %v166_v5, %v167_v6 }
  0x2e   : > { %170 = vst.msk [vmem:[%s159_s17] sm:$0x1] %vm169_vm1, %v168_v7 }
  0x2f   : > { %391 = shalt.err (!%p388_p13)
}
  0x30   : > { %274 = dma.vmem_to_hbm [thread:$0]  (%p509_p9), %s184_s22, 16, %s186_s23, %s172_s18  }
  0x31 PF: > { %s197_s30 = sand.u32 1, %s426_s6   ;;  %p281_p0 = pnand %p265_p12, %p516_p11 }
  0x32   : > { %s198_s2 = scalar_lea.sflag [#allocation4], %s197_s30 }
  0x33   : > { %p282_p1 = pneg %p281_p0 }
  0x35   : > { %421 = dma.done.wait (%p282_p1), %s198_s2, 16  }
  0x36   : > { %423 = vsyncadd (%p282_p1), %s198_s2, 4294967280  ;;  %s17_s11 = sadd.s32 1, %s446_s11   ;;  %s585_s6 = smov %s430_s7 }
  0x37   : > { %p14_p2 = scmp.ge.s32.totalorder %s17_s11, 4   ;;  %s586_s7 = smov %s434_s8 }
  0x38   : > { %s587_s8 = smov %s514_s20  ;;  %s588_s9 = smov %s442_s10 }
  0x39   : > { %s589_s10 = smov %s591_s14  ;;  %16 = sbr.rel (!%p14_p2) target bundleno = 6 (0x6), region = 69 }
  0x3e   :  { %203 = vsyncpa [#allocation3], 1 }
  0x3f   :  { %205 = vsyncpa [#allocation3 + $0x1], 1 }
  0x40   :  { %206 = vsyncpa [#allocation4], 1 }
  0x41   :  { %208 = vsyncpa [#allocation4 + $0x1], 1 }

</bundles_post_ra>
